<compile_context>
chip_gen: v7x
topology: tpu7x:2x2x1
jax: 0.10.0
libtpu: 0.0.40
codegen_flags: <defaults>
</compile_context>

<pallas_src>
import functools
import math

import jax
import jax.numpy as jnp
from jax.experimental import pallas as pl
from jax.experimental.pallas import tpu as pltpu


# ---------------------------------------------------------------------------
# In-kernel helpers
# ---------------------------------------------------------------------------

def _edge_masks(mb, w_out):
    """Sequence-boundary masks built in-register (no extra input streams).

    Valid because every block holds a whole number of length-W_out sequences
    (asserted in the wrapper), so lane rotation only bleeds across sequence
    boundaries, which these masks zero out (== the conv zero padding)."""
    col = jax.lax.broadcasted_iota(jnp.int32, (1, mb), 1) % w_out
    mnf = (col != 0).astype(jnp.float32)          # not first column of a seq
    mnl = (col != w_out - 1).astype(jnp.float32)  # not last  column of a seq
    return mnf, mnl


def _taps(v, mnf, mnl):
    """+-1 time-neighbour taps via XLU lane rotation, zeroed at seq edges."""
    mb = v.shape[-1]
    prev = pltpu.roll(v, shift=1, axis=1) * mnf       # v[:, m-1]
    nxt = pltpu.roll(v, shift=mb - 1, axis=1) * mnl   # v[:, m+1]
    return prev, nxt


def _conv3(w_ref, v_prev, v, v_next):
    """3-tap conv as three accumulating MXU dots (no (3*C, Mb) temporary).
    w_ref is (3, Cout, C) in kernel-tap order (prev, centre, next)."""
    return (jnp.dot(w_ref[0], v_prev, preferred_element_type=jnp.float32)
            + jnp.dot(w_ref[1], v, preferred_element_type=jnp.float32)
            + jnp.dot(w_ref[2], v_next, preferred_element_type=jnp.float32))


def _s1_body(x_ref, w1_ref, b1_ref, w2_ref, b2_ref, w_out):
    """stride_t == 1: conv1 taps are built in-kernel from the centre slab."""
    x = x_ref[...]
    mnf, mnl = _edge_masks(x.shape[-1], w_out)
    x_prev, x_next = _taps(x, mnf, mnl)
    h = jnp.maximum(_conv3(w1_ref, x_prev, x, x_next) + b1_ref[...], 0.0)
    h_prev, h_next = _taps(h, mnf, mnl)
    out2 = _conv3(w2_ref, h_prev, h, h_next) + b2_ref[...]
    return out2, x


def _s1_ident_kernel(x_ref, w1_ref, b1_ref, w2_ref, b2_ref, o_ref, *, w_out):
    out2, x = _s1_body(x_ref, w1_ref, b1_ref, w2_ref, b2_ref, w_out)
    o_ref[...] = jnp.maximum(out2 + x, 0.0).astype(o_ref.dtype)


def _s1_proj_kernel(x_ref, w1_ref, b1_ref, w2_ref, b2_ref, wsc_ref, o_ref, *,
                    w_out):
    out2, x = _s1_body(x_ref, w1_ref, b1_ref, w2_ref, b2_ref, w_out)
    sc = jnp.dot(wsc_ref[...], x, preferred_element_type=jnp.float32)
    o_ref[...] = jnp.maximum(out2 + sc, 0.0).astype(o_ref.dtype)


def _sN_proj_kernel(x1_ref, w1_ref, b1_ref, w2_ref, b2_ref, wsc_ref, o_ref, *,
                    cin, w_out):
    """stride_t > 1: conv1 taps pre-packed on sublanes (wrapper im2col);
    the shortcut reuses the centre-tap rows [0:Cin) of the slab."""
    x1 = x1_ref[...]
    h = jnp.maximum(
        jnp.dot(w1_ref[...], x1, preferred_element_type=jnp.float32)
        + b1_ref[...], 0.0)
    mnf, mnl = _edge_masks(h.shape[-1], w_out)
    h_prev, h_next = _taps(h, mnf, mnl)
    out2 = _conv3(w2_ref, h_prev, h, h_next) + b2_ref[...]
    sc = jnp.dot(wsc_ref[...], x1[:cin, :], preferred_element_type=jnp.float32)
    o_ref[...] = jnp.maximum(out2 + sc, 0.0).astype(o_ref.dtype)


# ---------------------------------------------------------------------------
# Wrapper-side helpers
# ---------------------------------------------------------------------------

def _fold_bn(gamma, beta, mean, var, eps=1e-5):
    s = gamma / jnp.sqrt(var + eps)
    return s, beta - mean * s


def _vmem_capacity_bytes():
    try:
        info = pltpu.get_tpu_info()
        cap = int(getattr(info, "vmem_capacity_bytes", 0) or 0)
        if cap > 0:
            return cap
    except Exception:
        pass
    return 64 << 20   # conservative fallback (v7x per-TensorCore)


def _per_col_vmem_bytes(rows_in, cin, cout):
    # double-buffered input & output blocks + in-kernel f32 temporaries
    # (rolled taps, h, partial dot results) per lane column.
    return 4 * (2 * rows_in + 2 * cout + 8 * cout + 2 * cin)


def _pick_block_cols(m_pad, w_out, per_col, vmem_budget):
    """Lane-axis block: a multiple of lcm(128, W_out) (whole sequences, no
    masked vst), as large as the VMEM budget allows, with >=2 grid steps when
    possible so both v7x TensorCores get work; per-step overhead (~0.35us) is
    then negligible."""
    step = (128 * w_out) // math.gcd(128, w_out)
    max_cols = max(step, (vmem_budget // per_col) // step * step)
    if m_pad >= 2 * step:
        target = min(max_cols, (m_pad // 2) // step * step)
    else:
        target = min(max_cols, m_pad)
    mb = max(step, min(target, m_pad))
    while m_pad % mb:
        mb -= step
    return mb


def basic_block_forward(x, params, stride_t, eps=1e-5, block_cols=None):
    N, Cin, H, W = x.shape
    Cout = params["w1"].shape[0]
    W_out = (W - 1) // stride_t + 1
    B = N * H
    M = B * W_out
    has_proj = (Cin != Cout) or (stride_t != 1)

    # Fold BN into the tiny weight matrices; only per-channel biases go
    # in-kernel.  Shortcut-BN bias is folded into b2.
    s1, b1 = _fold_bn(params["g1"], params["be1"], params["m1"], params["v1"], eps)
    s2, b2 = _fold_bn(params["g2"], params["be2"], params["m2"], params["v2"], eps)
    w1k = params["w1"][:, :, 0, :]                           # (Cout, Cin, 3)
    w2k = params["w2"][:, :, 0, :]                           # (Cout, Cout, 3)
    w2t = jnp.transpose(w2k, (2, 0, 1)) * s2[None, :, None]  # (3, Cout, Cout)

    wscf = None
    b2_eff = b2
    if has_proj:
        ssc, bsc = _fold_bn(params["gsc"], params["besc"],
                            params["msc"], params["vsc"], eps)
        wscf = params["wsc"][:, :, 0, 0] * ssc[:, None]      # (Cout, Cin)
        b2_eff = b2 + bsc

    # rows layout (B, W, Cin): each (n, h) pair is an independent 1-D sequence.
    xr = jnp.transpose(x, (0, 2, 3, 1)).reshape(B, W, Cin)

    rep = lambda i: (0, 0)
    rep3 = lambda i: (0, 0, 0)
    if stride_t == 1:
        # Centre slab only; conv1's +-1 taps are built in-kernel.
        slab = jnp.transpose(xr, (2, 0, 1)).reshape(Cin, M)
        rows_in = Cin
        w1_arg = jnp.transpose(w1k, (2, 0, 1)) * s1[None, :, None]  # (3,Cout,Cin)
        w1_spec = pl.BlockSpec((3, Cout, Cin), rep3)
    else:
        # Strided taps cannot be expressed as lane rolls -> small wrapper
        # im2col; rows ordered (centre, prev, next) so the shortcut reuses
        # rows [0:Cin) of the same slab (no extra HBM input).
        xp = jnp.pad(xr, ((0, 0), (1, 1), (0, 0)))
        span = stride_t * (W_out - 1) + 1
        taps = [xp[:, k:k + span:stride_t, :] for k in (1, 0, 2)]
        x1 = jnp.stack(taps, axis=0)                         # (3, B, W_out, Cin)
        slab = jnp.transpose(x1, (0, 3, 1, 2)).reshape(3 * Cin, M)
        rows_in = 3 * Cin
        w1_arg = jnp.concatenate(
            [w1k[:, :, 1], w1k[:, :, 0], w1k[:, :, 2]], axis=1) * s1[:, None]
        w1_spec = pl.BlockSpec((Cout, 3 * Cin), rep)

    # Pad the lane axis so every block is a whole number of sequences AND a
    # multiple of 128 lanes (full unmasked vst tiles, splittable across TCs).
    step = (128 * W_out) // math.gcd(128, W_out)
    M_pad = ((M + step - 1) // step) * step
    if M_pad != M:
        slab = jnp.pad(slab, ((0, 0), (0, M_pad - M)))

    # Block size from per-generation VMEM capacity.
    vmem_cap = _vmem_capacity_bytes()
    vmem_limit = max(32 << 20, min(vmem_cap - (16 << 20), 100 << 20))
    per_col = _per_col_vmem_bytes(rows_in, Cin, Cout)
    if block_cols is None:
        Mb = _pick_block_cols(M_pad, W_out, per_col, vmem_limit // 2)
    else:
        Mb = block_cols
    assert Mb % W_out == 0 and M_pad % Mb == 0, (
        "block_cols must be a multiple of W_out and divide the padded M "
        "(roll/mask sequence-boundary invariant)")

    col_blk = lambda i: (0, i)
    in_specs = [
        pl.BlockSpec((rows_in, Mb), col_blk),                # input slab
        w1_spec,                                             # w1 (BN folded)
        pl.BlockSpec((Cout, 1), rep),                        # b1
        pl.BlockSpec((3, Cout, Cout), rep3),                 # w2 (BN folded)
        pl.BlockSpec((Cout, 1), rep),                        # b2 (+ shortcut bias)
    ]
    args = [slab, w1_arg, b1[:, None], w2t, b2_eff[:, None]]
    if has_proj:
        in_specs.append(pl.BlockSpec((Cout, Cin), rep))      # wsc (BN folded)
        args.append(wscf)
        if stride_t == 1:
            kernel = functools.partial(_s1_proj_kernel, w_out=W_out)
        else:
            kernel = functools.partial(_sN_proj_kernel, cin=Cin, w_out=W_out)
    else:
        kernel = functools.partial(_s1_ident_kernel, w_out=W_out)

    # Only raise the scoped-VMEM limit when the working set actually needs it.
    weight_bytes = 4 * (3 * Cout * Cin + 3 * Cout * Cout + Cout * Cin + 4 * Cout)
    est_vmem = per_col * Mb + 2 * weight_bytes
    cp_kwargs = dict(dimension_semantics=("parallel",))
    if est_vmem > (12 << 20):
        cp_kwargs["vmem_limit_bytes"] = int(vmem_limit)

    out = pl.pallas_call(
        kernel,
        out_shape=jax.ShapeDtypeStruct((Cout, M_pad), x.dtype),
        grid_spec=pltpu.PrefetchScalarGridSpec(
            num_scalar_prefetch=0,
            grid=(M_pad // Mb,),
            in_specs=in_specs,
            out_specs=pl.BlockSpec((Cout, Mb), col_blk),
        ),
        compiler_params=pltpu.CompilerParams(**cp_kwargs),
    )(*args)

    out = out[:, :M]
    return jnp.transpose(out.reshape(Cout, N, H, W_out), (1, 0, 2, 3))


# ---------------------------------------------------------------------------
# Pure-JAX reference (inference-mode BN), mirroring the PyTorch forward
# ---------------------------------------------------------------------------

def ref_forward(x, params, stride_t, eps=1e-5):
    def conv(inp, w, stride, pad):
        return jax.lax.conv_general_dilated(
            inp, w, window_strides=(1, stride), padding=((0, 0), pad),
            dimension_numbers=("NCHW", "OIHW", "NCHW"))

    def bn(inp, g, b, m, v):
        s = g / jnp.sqrt(v + eps)
        return inp * s[None, :, None, None] + (b - m * s)[None, :, None, None]

    out = jax.nn.relu(bn(conv(x, params["w1"], stride_t, (1, 1)),
                         params["g1"], params["be1"], params["m1"], params["v1"]))
    out = bn(conv(out, params["w2"], 1, (1, 1)),
             params["g2"], params["be2"], params["m2"], params["v2"])
    Cin, Cout = x.shape[1], params["w1"].shape[0]
    if Cin != Cout or stride_t != 1:
        sc = bn(conv(x, params["wsc"], stride_t, (0, 0)),
                params["gsc"], params["besc"], params["msc"], params["vsc"])
    else:
        sc = x
    return jax.nn.relu(out + sc)


if __name__ == "__main__":
    key = jax.random.PRNGKey(0)

    def normal(k, shape, scale=0.1):
        return scale * jax.random.normal(k, shape, jnp.float32)

    def make_params(k, in_ch, out_ch):
        ks = jax.random.split(k, 15)
        return {
            "w1": normal(ks[0], (out_ch, in_ch, 1, 3)),
            "w2": normal(ks[1], (out_ch, out_ch, 1, 3)),
            "wsc": normal(ks[2], (out_ch, in_ch, 1, 1)),
            "g1": 1.0 + normal(ks[3], (out_ch,)),
            "be1": normal(ks[4], (out_ch,)),
            "m1": normal(ks[5], (out_ch,)),
            "v1": jnp.abs(normal(ks[6], (out_ch,))) + 0.5,
            "g2": 1.0 + normal(ks[7], (out_ch,)),
            "be2": normal(ks[8], (out_ch,)),
            "m2": normal(ks[9], (out_ch,)),
            "v2": jnp.abs(normal(ks[10], (out_ch,))) + 0.5,
            "gsc": 1.0 + normal(ks[11], (out_ch,)),
            "besc": normal(ks[12], (out_ch,)),
            "msc": normal(ks[13], (out_ch,)),
            "vsc": jnp.abs(normal(ks[14], (out_ch,))) + 0.5,
        }

    kp1, kp2, kp3, kx = jax.random.split(key, 4)

    # Case 1: projection shortcut (channel expansion + temporal stride 2).
    N, in_ch, H, W, out_ch, stride_t = 2, 4, 16, 16, 8, 2
    params = make_params(kp1, in_ch, out_ch)
    x = jax.random.normal(kx, (N, in_ch, H, W), jnp.float32)
    y = jax.block_until_ready(basic_block_forward(x, params, stride_t))
    y_ref = ref_forward(x, params, stride_t)
    assert y.shape == (N, out_ch, H, (W - 1) // stride_t + 1), y.shape
    assert jnp.allclose(y, y_ref, atol=2e-4, rtol=2e-4), float(
        jnp.max(jnp.abs(y - y_ref)))

    # Case 2: identity shortcut (same channels, stride 1) -> in-kernel conv1 taps.
    params2 = make_params(kp2, out_ch, out_ch)
    x2 = jax.random.normal(kx, (N, out_ch, H, W), jnp.float32)
    y2 = jax.block_until_ready(basic_block_forward(x2, params2, 1))
    y2_ref = ref_forward(x2, params2, 1)
    assert y2.shape == (N, out_ch, H, W), y2.shape
    assert jnp.allclose(y2, y2_ref, atol=2e-4, rtol=2e-4), float(
        jnp.max(jnp.abs(y2 - y2_ref)))

    # Case 3: projection with stride 1 and a time length whose flattened M is
    # not a multiple of 128 (exercises the lane-axis zero-padding path).
    N3, in3, H3, W3, out3 = 2, 4, 16, 10, 8
    params3 = make_params(kp3, in3, out3)
    x3 = jax.random.normal(kx, (N3, in3, H3, W3), jnp.float32)
    y3 = jax.block_until_ready(basic_block_forward(x3, params3, 1))
    y3_ref = ref_forward(x3, params3, 1)
    assert y3.shape == (N3, out3, H3, W3), y3.shape
    assert jnp.allclose(y3, y3_ref, atol=2e-4, rtol=2e-4), float(
        jnp.max(jnp.abs(y3 - y3_ref)))

    print("KERNEL_OK")
</pallas_src>

<mosaic_0001>
module attributes {stable_mosaic.version = 11 : i64} {
  func.func @_sN_proj_kernel(%arg0: i32, %arg1: memref<12x128xf32, #tpu.memory_space<vmem>>, %arg2: memref<8x12xf32, #tpu.memory_space<vmem>>, %arg3: memref<8x1xf32, #tpu.memory_space<vmem>>, %arg4: memref<3x8x8xf32, #tpu.memory_space<vmem>>, %arg5: memref<8x1xf32, #tpu.memory_space<vmem>>, %arg6: memref<8x4xf32, #tpu.memory_space<vmem>>, %arg7: memref<8x128xf32, #tpu.memory_space<vmem>>) attributes {dimension_semantics = [#tpu.dimension_semantics<parallel>], iteration_bounds = array<i64: 2>, scalar_prefetch = 0 : i64, scratch_operands = 0 : i64, tpu.core_type = #tpu.core_type<tc>, window_params = [{transform_indices = @transform_0, window_bounds = array<i64: 12, 128>}, {pipeline_mode = #tpu.pipeline_mode<synchronous>, transform_indices = @transform_1, window_bounds = array<i64: 8, 12>}, {pipeline_mode = #tpu.pipeline_mode<synchronous>, transform_indices = @transform_2, window_bounds = array<i64: 8, 1>}, {pipeline_mode = #tpu.pipeline_mode<synchronous>, transform_indices = @transform_3, window_bounds = array<i64: 3, 8, 8>}, {pipeline_mode = #tpu.pipeline_mode<synchronous>, transform_indices = @transform_4, window_bounds = array<i64: 8, 1>}, {pipeline_mode = #tpu.pipeline_mode<synchronous>, transform_indices = @transform_5, window_bounds = array<i64: 8, 4>}, {transform_indices = @transform_6, window_bounds = array<i64: 8, 128>}]} {
    %c0 = arith.constant 0 : index
    %c0_0 = arith.constant 0 : index
    %0 = vector.load %arg1[%c0, %c0_0] : memref<12x128xf32, #tpu.memory_space<vmem>>, vector<12x128xf32>
    %c0_1 = arith.constant 0 : index
    %c0_2 = arith.constant 0 : index
    %1 = vector.load %arg2[%c0_1, %c0_2] : memref<8x12xf32, #tpu.memory_space<vmem>>, vector<8x12xf32>
    %cst = arith.constant dense<0.000000e+00> : vector<8x128xf32>
    %2 = tpu.matmul %1, %0, %cst {dimension_numbers = #tpu.dot_dimension_numbers<[1], [0], [0], [1], [0, 0, 1, 1], [], []>} : vector<8x12xf32>, vector<12x128xf32>, vector<8x128xf32> -> vector<8x128xf32>
    %c0_3 = arith.constant 0 : index
    %c0_4 = arith.constant 0 : index
    %3 = vector.load %arg3[%c0_3, %c0_4] : memref<8x1xf32, #tpu.memory_space<vmem>>, vector<8x1xf32>
    %4 = vector.broadcast %3 : vector<8x1xf32> to vector<8x128xf32>
    %5 = arith.addf %2, %4 : vector<8x128xf32>
    %cst_5 = arith.constant 0.000000e+00 : f32
    %6 = vector.broadcast %cst_5 : f32 to vector<8x128xf32>
    %7 = arith.maximumf %5, %6 : vector<8x128xf32>
    %8 = tpu.iota {dimensions = array<i32: 1>} : vector<1x128xi32>
    %c8_i32 = arith.constant 8 : i32
    %c0_i32 = arith.constant 0 : i32
    %9 = arith.cmpi eq, %c8_i32, %c0_i32 : i32
    %c1_i32 = arith.constant 1 : i32
    %10 = arith.select %9, %c1_i32, %c8_i32 : i32
    %11 = vector.broadcast %10 : i32 to vector<1x128xi32>
    %12 = arith.remsi %8, %11 : vector<1x128xi32>
    %c0_i32_6 = arith.constant 0 : i32
    %13 = vector.broadcast %c0_i32_6 : i32 to vector<1x128xi32>
    %14 = arith.cmpi ne, %12, %13 : vector<1x128xi32>
    %c0_i32_7 = arith.constant 0 : i32
    %15 = vector.broadcast %c0_i32_7 : i32 to vector<1x128xi32>
    %16 = arith.cmpi slt, %12, %15 : vector<1x128xi32>
    %c0_i32_8 = arith.constant 0 : i32
    %17 = arith.cmpi slt, %10, %c0_i32_8 : i32
    %18 = vector.broadcast %17 : i1 to vector<1x128xi1>
    %19 = vector.broadcast %18 : vector<1x128xi1> to vector<1x128xi1>
    %20 = arith.xori %16, %19 : vector<1x128xi1>
    %21 = arith.andi %20, %14 : vector<1x128xi1>
    %22 = vector.broadcast %10 : i32 to vector<1x128xi32>
    %23 = arith.addi %12, %22 : vector<1x128xi32>
    %24 = arith.select %21, %23, %12 : vector<1x128xi1>, vector<1x128xi32>
    %c0_i32_9 = arith.constant 0 : i32
    %25 = vector.broadcast %c0_i32_9 : i32 to vector<1x128xi32>
    %26 = arith.cmpi ne, %24, %25 : vector<1x128xi32>
    %27 = arith.extui %26 : vector<1x128xi1> to vector<1x128xi32>
    %28 = arith.sitofp %27 : vector<1x128xi32> to vector<1x128xf32>
    %c7_i32 = arith.constant 7 : i32
    %29 = vector.broadcast %c7_i32 : i32 to vector<1x128xi32>
    %30 = arith.cmpi ne, %24, %29 : vector<1x128xi32>
    %31 = arith.extui %30 : vector<1x128xi1> to vector<1x128xi32>
    %32 = arith.sitofp %31 : vector<1x128xi32> to vector<1x128xf32>
    %c1_i32_10 = arith.constant 1 : i32
    %33 = tpu.dynamic_rotate %7 by %c1_i32_10 dim 1 : vector<8x128xf32>, i32 -> vector<8x128xf32>
    %34 = vector.broadcast %28 : vector<1x128xf32> to vector<8x128xf32>
    %35 = arith.mulf %33, %34 : vector<8x128xf32>
    %c127_i32 = arith.constant 127 : i32
    %36 = tpu.dynamic_rotate %7 by %c127_i32 dim 1 : vector<8x128xf32>, i32 -> vector<8x128xf32>
    %37 = vector.broadcast %32 : vector<1x128xf32> to vector<8x128xf32>
    %38 = arith.mulf %36, %37 : vector<8x128xf32>
    %c0_11 = arith.constant 0 : index
    %c0_12 = arith.constant 0 : index
    %c0_13 = arith.constant 0 : index
    %39 = vector.load %arg4[%c0_11, %c0_12, %c0_13] : memref<3x8x8xf32, #tpu.memory_space<vmem>>, vector<1x8x8xf32>
    %40 = vector.shape_cast %39 : vector<1x8x8xf32> to vector<8x8xf32>
    %cst_14 = arith.constant dense<0.000000e+00> : vector<8x128xf32>
    %41 = tpu.matmul %40, %35, %cst_14 {dimension_numbers = #tpu.dot_dimension_numbers<[1], [0], [0], [1], [0, 0, 1, 1], [], []>} : vector<8x8xf32>, vector<8x128xf32>, vector<8x128xf32> -> vector<8x128xf32>
    %c1 = arith.constant 1 : index
    %c0_15 = arith.constant 0 : index
    %c0_16 = arith.constant 0 : index
    %42 = vector.load %arg4[%c1, %c0_15, %c0_16] : memref<3x8x8xf32, #tpu.memory_space<vmem>>, vector<1x8x8xf32>
    %43 = vector.shape_cast %42 : vector<1x8x8xf32> to vector<8x8xf32>
    %cst_17 = arith.constant dense<0.000000e+00> : vector<8x128xf32>
    %44 = tpu.matmul %43, %7, %cst_17 {dimension_numbers = #tpu.dot_dimension_numbers<[1], [0], [0], [1], [0, 0, 1, 1], [], []>} : vector<8x8xf32>, vector<8x128xf32>, vector<8x128xf32> -> vector<8x128xf32>
    %45 = arith.addf %41, %44 : vector<8x128xf32>
    %c2 = arith.constant 2 : index
    %c0_18 = arith.constant 0 : index
    %c0_19 = arith.constant 0 : index
    %46 = vector.load %arg4[%c2, %c0_18, %c0_19] : memref<3x8x8xf32, #tpu.memory_space<vmem>>, vector<1x8x8xf32>
    %47 = vector.shape_cast %46 : vector<1x8x8xf32> to vector<8x8xf32>
    %cst_20 = arith.constant dense<0.000000e+00> : vector<8x128xf32>
    %48 = tpu.matmul %47, %38, %cst_20 {dimension_numbers = #tpu.dot_dimension_numbers<[1], [0], [0], [1], [0, 0, 1, 1], [], []>} : vector<8x8xf32>, vector<8x128xf32>, vector<8x128xf32> -> vector<8x128xf32>
    %49 = arith.addf %45, %48 : vector<8x128xf32>
    %c0_21 = arith.constant 0 : index
    %c0_22 = arith.constant 0 : index
    %50 = vector.load %arg5[%c0_21, %c0_22] : memref<8x1xf32, #tpu.memory_space<vmem>>, vector<8x1xf32>
    %51 = vector.broadcast %50 : vector<8x1xf32> to vector<8x128xf32>
    %52 = arith.addf %49, %51 : vector<8x128xf32>
    %c0_23 = arith.constant 0 : index
    %c0_24 = arith.constant 0 : index
    %53 = vector.load %arg6[%c0_23, %c0_24] : memref<8x4xf32, #tpu.memory_space<vmem>>, vector<8x4xf32>
    %54 = vector.extract_strided_slice %0 {offsets = [0, 0], sizes = [4, 128], strides = [1, 1]} : vector<12x128xf32> to vector<4x128xf32>
    %cst_25 = arith.constant dense<0.000000e+00> : vector<8x128xf32>
    %55 = tpu.matmul %53, %54, %cst_25 {dimension_numbers = #tpu.dot_dimension_numbers<[1], [0], [0], [1], [0, 0, 1, 1], [], []>} : vector<8x4xf32>, vector<4x128xf32>, vector<8x128xf32> -> vector<8x128xf32>
    %56 = arith.addf %52, %55 : vector<8x128xf32>
    %cst_26 = arith.constant 0.000000e+00 : f32
    %57 = vector.broadcast %cst_26 : f32 to vector<8x128xf32>
    %58 = arith.maximumf %56, %57 : vector<8x128xf32>
    %c0_27 = arith.constant 0 : index
    %c0_28 = arith.constant 0 : index
    %59 = vector.load %arg7[%c0_27, %c0_28] : memref<8x128xf32, #tpu.memory_space<vmem>>, vector<8x128xf32>
    tpu.vector_store %arg7[%c0_27, %c0_28], %58 {strides = array<i32>} : memref<8x128xf32, #tpu.memory_space<vmem>>, vector<8x128xf32>,
    return
  }
  func.func @transform_0(%arg0: i32) -> (i32, i32) {
    %c0_i32 = arith.constant 0 : i32
    %c0_i32_0 = arith.constant 0 : i32
    return %c0_i32, %arg0 : i32, i32
  }
  func.func @transform_1(%arg0: i32) -> (i32, i32) {
    %c0_i32 = arith.constant 0 : i32
    %c0_i32_0 = arith.constant 0 : i32
    %c0_i32_1 = arith.constant 0 : i32
    return %c0_i32, %c0_i32_0 : i32, i32
  }
  func.func @transform_2(%arg0: i32) -> (i32, i32) {
    %c0_i32 = arith.constant 0 : i32
    %c0_i32_0 = arith.constant 0 : i32
    %c0_i32_1 = arith.constant 0 : i32
    return %c0_i32, %c0_i32_0 : i32, i32
  }
  func.func @transform_3(%arg0: i32) -> (i32, i32, i32) {
    %c0_i32 = arith.constant 0 : i32
    %c0_i32_0 = arith.constant 0 : i32
    %c0_i32_1 = arith.constant 0 : i32
    %c0_i32_2 = arith.constant 0 : i32
    return %c0_i32, %c0_i32_0, %c0_i32_1 : i32, i32, i32
  }
  func.func @transform_4(%arg0: i32) -> (i32, i32) {
    %c0_i32 = arith.constant 0 : i32
    %c0_i32_0 = arith.constant 0 : i32
    %c0_i32_1 = arith.constant 0 : i32
    return %c0_i32, %c0_i32_0 : i32, i32
  }
  func.func @transform_5(%arg0: i32) -> (i32, i32) {
    %c0_i32 = arith.constant 0 : i32
    %c0_i32_0 = arith.constant 0 : i32
    %c0_i32_1 = arith.constant 0 : i32
    return %c0_i32, %c0_i32_0 : i32, i32
  }
  func.func @transform_6(%arg0: i32) -> (i32, i32) {
    %c0_i32 = arith.constant 0 : i32
    %c0_i32_0 = arith.constant 0 : i32
    return %c0_i32, %arg0 : i32, i32
  }
}

</mosaic_0001>

<bundles_post_ra>
// kernel: tpu_custom_call.1
= control target key start
LH: loop header
LB: loop body
LE: loop exit
PB: predicated region body
PF: predicated region fallthrough
CT: control target
= control target key end

     0   :  { %11 = vsyncpa [#allocation3], 0  ;;  %s1249_s0 = inlined_call_operand.hbm [shape: f32[12,256], index: 0, kind: input, shape index: {}]   ;;  %s1250_s1 = inlined_call_operand.vmem [shape: f32[8,12], index: 1, kind: input, shape index: {}]   ;;  %s1251_s2 = inlined_call_operand.vmem [shape: f32[8,1], index: 2, kind: input, shape index: {}]   ;;  %s1252_s3 = inlined_call_operand.vmem [shape: f32[3,8,8], index: 3, kind: input, shape index: {}]   ;;  %s1253_s4 = inlined_call_operand.vmem [shape: f32[8,1], index: 4, kind: input, shape index: {}]   ;;  %s1254_s5 = inlined_call_operand.vmem [shape: f32[8,4], index: 5, kind: input, shape index: {}]   ;;  %s1255_s6 = inlined_call_operand.hbm [shape: f32[8,256], index: 6, kind: output, shape index: {}]  }
   0x1   :  { %13 = vsyncpa [#allocation3 + $0x1], 0 }
   0x2   :  { %14 = vsyncpa [#allocation4], 0 }
   0x3   :  { %16 = vsyncpa [#allocation4 + $0x1], 0  ;;  %s1055_s21 = smov 0   ;;  %s1057_s22 = smov 0  }
   0x4   :  { %s1059_s23 = smov 0   ;;  %s1061_s24 = smov 0  }
   0x5 LB: > { %s1076_s25 = sadd.s32 4294967295, %s1006_s24   ;;  %s781_s26 = sadd.s32 4294967294, %s1006_s24   ;;  %s1006_s24 = sphi %s1061_s24, %s1269_s24   ;;  %s1002_s23 = sphi %s1059_s23, %s1268_s23   ;;  %s998_s22 = sphi %s1057_s22, %s1267_s22   ;;  %s994_s21 = sphi %s1055_s21, %s1266_s21  }
   0x6   : > { %s1080_s27 = sadd.s32 1, %s1006_s24   ;;  %s29_s28 = sadd.s32 1, %s1002_s23 }
   0x7   : > { %s26_s29 = ssub.s32 %s1006_s24, %s1080_s27  ;;  %p36_p0 = scmp.ne.s32.totalorder %s1002_s23, %s998_s22 }
   0x8   : > { %p27_p1 = scmp.eq.s32.totalorder %s26_s29, 0  ;;  %p37_p2 = scmp.eq.s32.totalorder %s1006_s24, 0 }
   0x9   : > { %p42_p3 = scmp.ne.s32.totalorder %s998_s22, %s994_s21  ;;  %p43_p4 = scmp.eq.s32.totalorder %s1076_s25, 0 }
   0xa   : > { %s1092_s30 = scalar_select %p27_p1, %s1002_s23, %s29_s28  }
   0xb   : > { %p1094_p5 = por %p37_p2, %p36_p0  ;;  %p1098_p6 = por %p43_p4, %p42_p3 }
   0xc   : > { %p171_p7 = scmp.eq.s32.totalorder %s1076_s25, 1  ;;  %p177_p8 = scmp.eq.s32.totalorder %s781_s26, 1 }
   0xd   : > { %p864_p10 = scmp.lt.s32.totalorder %s1006_s24, 2  ;;  %s212_s11 = sand.u32 1, %s1002_s23  }
   0xe   : > { %p1105_p11 = por %p171_p7, %p36_p0  ;;  %p1109_p12 = por %p177_p8, %p42_p3 }
   0xf   : > { %s785_s12 = sshll.u32 %s1006_s24, 7  ;;  %s784_s13 = sshll.u32 %s212_s11, 4 }
  0x10   : > { %s1259_s9 = scalar_select %p1105_p11, 1, 0 }
  0x11   : > { %s1260_s10 = scalar_select %p1109_p12, 1, 0 }
  0x12   : > { %s1118_s16 = scalar_lea.hbm %s1249_s0, %s785_s12  ;;  %s216_s17 = scalar_lea.vmem [#allocation2], %s784_s13 }
  0x13   : > { %s222_s18 = sshll.u32 %s216_s17, 4  ;;  %p1122_p13 = pnand %p864_p10, %p1094_p5  ;;  %s1126_s18 = int_to_ptr.vmem [resolvable:$true] %s222_s18 }
  0x14   : > { %s1129_s20 = scalar_lea.sflag [#allocation3], %s212_s11  ;;  %s910_s26 = scalar_lea.hbm %s1118_s16, 256 }
  0x15   : > { %p911_p1 = scmp.ne.s32.totalorder %s1118_s16, %s910_s26  ;;  %p912_p2 = pneg %p1122_p13 }
  0x16   : > { %s915_s7 = scalar_lea.hbm %s1249_s0, 512  ;;  %p916_p5 = scmp.lt.u32.totalorder %s1118_s16, %s1249_s0 }
  0x17   : > { %p913_p3 = pnand %p912_p2, %p911_p1  ;;  %p917_p7 = scmp.lt.u32.totalorder %s915_s7, %s910_s26 }
  0x18   : > { %p919_p10 = scmp.lt.u32.totalorder %s910_s26, %s1118_s16 }
  0x19   : > { %p914_p4 = pneg %p913_p3  ;;  %p918_p8 = por %p917_p7, %p916_p5 }
  0x1b   : > { %p920_p9 = por %p919_p10, %p918_p8 }
  0x1d   : > { %p921_p0 = pnand %p920_p9, %p914_p4 }
  0x1f   : > { %924 = shalt.err (!%p921_p0)
}
  0x20   : > { %s925_s11 = scalar_lea.vmem %s1126_s18, 256  ;;  %s1008_s14 = smov [#allocation2]  }
  0x21   : > { %p926_p1 = scmp.ne.s32.totalorder %s1126_s18, %s925_s11  ;;  %s930_s15 = sshll.u32 %s1008_s14, 4  ;;  %s931_s15 = int_to_ptr.vmem [resolvable:$false] %s930_s15 }
  0x22   : > { %s932_s17 = scalar_lea.vmem %s931_s15, 512  ;;  %p933_p11 = scmp.lt.s32.totalorder %s1126_s18, %s931_s15 }
  0x23   : > { %p928_p3 = pnand %p926_p1, %p912_p2  ;;  %p934_p5 = scmp.lt.s32.totalorder %s932_s17, %s925_s11 }
  0x25   : > { %p929_p12 = pneg %p928_p3  ;;  %p935_p7 = por %p934_p5, %p933_p11 }
  0x27   : > { %p936_p8 = pnand %p935_p7, %p929_p12 }
  0x29   : > { %939 = shalt.err (!%p936_p8)
}
  0x2a   : > { %s1009_s26 = smov 256   ;;  %s1010_s28 = smov 128  }
  0x2b   : > { %s1011_s29 = smov 8   ;;  %p230_p9 = scmp.lt.s32.totalorder %s1006_s24, 3 }
  0x2c   : > { %859 = dma.hbm_to_vmem [thread:$0]  (!%p1122_p13), %s1118_s16, 256, %s1126_s18, %s1129_s20, %s1009_s26, %s1010_s28, %s1011_s29  }
  0x2d   : > { %p1262_p0 = scmp.ge.s32.totalorder %s1006_s24, 1 }
  0x2f   : > { %p231_p2 = pnand %p1262_p0, %p230_p9 }
  0x30   : > { %s1161_s7 = sand.u32 (!%p231_p2), 1, %s998_s22  }
  0x31   : > { %234 = sbr.rel (%p231_p2) target bundleno = 644 (0x284), region = 44  ;;  %s787_s12 = sshll.u32 (!%p231_p2), %s1161_s7, 4 }
  0x32   : > { %s237_s13 = scalar_lea.sflag (!%p231_p2), [#allocation3], %s1161_s7  ;;  %s240_s11 = scalar_lea.vmem (!%p231_p2), [#allocation2], %s787_s12 }
  0x38   : > { %985 = dma.done.wait (%p1098_p6), %s237_s13, 256  }
  0x39   : > { %987 = vsyncadd (%p1098_p6), %s237_s13, 4294967040  ;;  %v1012_v0 = vmov 0.0|0.0   ;;  %vm1013_vm0 = vmmov 0   ;;  %v1014_v1 = vmov 0.0   ;;  %v1015_v2 = vmov 0   ;;  %v269_v3 = vld [vmem:[%s240_s11] sm:$0xff] }
  0x3a   : > { %842 = vmatprep.subr.bf16.mxu0 %v1012_v0  ;;  %819 = vmatprep.mubr.msk.f32.mxu0 %vm1013_vm0, %v1014_v1  ;;  %vm282_vm1 = vcmask 1043456   ;;  %v270_v4 = vld [vmem:[%s240_s11 + $0x8] sm:$0xf]  ;;  %vm1016_vm2 = vmmov 1   ;;  %v272_v6 = vld [vmem:[%s1251_s2] sm:$0xff]  ;;  %vm278_vm4 = vcmask 97280   ;;  %v357_v15 = vlaneseq }
  0x3b   : > { %908 = vset.pattern.permute.xlu0 %v1015_v2  ;;  %827 = vmatprep.subr.mxu1 %v1014_v1  ;;  %vm844_vm3 = vmpackc.low %vm282_vm1, %vm1016_vm2  ;;  %v843_v5 = vpack.c.bf16 %v270_v4, %v269_v3  ;;  %v271_v7 = vld [vmem:[%s1250_s1] sm:$0xff]  ;;  %v793_v13 = vld [vmem:[%s1252_s3 + $0x8] sm:$0xff]  ;;  %s1017_s15 = smov 127   ;;  %s1018_s17 = smov 1   ;;  %vm386_vm5 = vcmask 64512   ;;  %vm617_vm8 = vcmask 31744  }
  0x3c   : > { %829 = vmatprep.mubr.msk.f32.mxu1 %vm1013_vm0, %v1014_v1  ;;  %909 = vset.pattern.permute.xlu1 %v1015_v2  ;;  %v609_v14 = vld [vmem:[%s1253_s4] sm:$0xff]  ;;  %v358_v16 = vand.u32 127, %v357_v15  ;;  %v796_v25 = vld [vmem:[%s1252_s3 + $0x10] sm:$0xff]  ;;  %s788_s18 = sshll.u32 %s1161_s7, 3  ;;  %s801_s19 = sshll.u32 %s1076_s25, 7 }
  0x3d   : > { %275 = vperm.xlu0 %908, %v272_v6   ;;  %845 = vmatpush3.bf16.msk.msra.mxu0 %vm844_vm3, %v843_v5  ;;  %v383_v23 = vld [vmem:[%s1252_s3] sm:$0xff]  ;;  %s268_s20 = scalar_lea.vmem [#allocation5], %s788_s18  ;;  %s1205_s26 = scalar_lea.hbm %s1255_s6, %s801_s19 }
  0x3e   : > { %822 = vmatprep.subr.mxu0 %v1014_v1  ;;  %v363_v17 = vand.u32 7, %v358_v16  ;;  %v616_v26 = vld [vmem:[%s1254_s5] sm:$0xff]  ;;  %s711_s14 = sshll.u32 %s268_s20, 4  ;;  %s698_s28 = scalar_lea.sflag [#allocation4], %s1161_s7  ;;  %s1207_s14 = int_to_ptr.vmem [resolvable:$true] %s711_s14 }
  0x3f   : > { %s940_s29 = scalar_lea.vmem %s1207_s14, 128  ;;  %p1263_p11 = scmp.ne.s32.totalorder %s1259_s9, 0 }
  0x40   : > { %820 = vmatmul.mubr.msk.f32.vlgmr.msra.gmra.mrb[0].mxu0 %vm278_vm4, %v271_v7  ;;  %vm371_vm6 = vcmp.ne.s32.totalorder %v363_v17, 0  ;;  %vm374_vm7 = vcmp.ne.s32.totalorder %v363_v17, 7  ;;  %p941_p6 = scmp.ne.s32.totalorder %s1207_s14, %s940_s29  ;;  %s1019_s25 = smov [#allocation5]  }
  0x41   : > { %824 = vmatprep.mubr.msk.f32.mxu0 %vm1013_vm0, %v1014_v1  ;;  %v791_v18 = vsel %vm371_vm6, 1.0, %v1014_v1  ;;  %v792_v19 = vsel %vm374_vm7, 1.0, %v1014_v1  ;;  %s944_s12 = sshll.u32 %s1019_s25, 4  ;;  %s945_s12 = int_to_ptr.vmem [resolvable:$false] %s944_s12 }
  0x42   : > { %p942_p12 = pnand %p941_p6, %p1263_p11  ;;  %s946_s13 = scalar_lea.vmem %s945_s12, 256 }
  0x43   : > { %p947_p4 = scmp.lt.s32.totalorder %s1207_s14, %s945_s12  ;;  %p948_p10 = scmp.lt.s32.totalorder %s946_s13, %s940_s29 }
  0x44   : > { %p943_p13 = pneg %p942_p12 }
  0x45   : > { %p949_p1 = por %p948_p10, %p947_p4 }
  0x47   : > { %p950_p3 = pnand %p949_p1, %p943_p13 }
  0xbc   : > { %v276_v8 = vpop.permute.xlu0 %275 }
 0x113   : > { %v352_v9 = vpop.f32.mrb[0].mxu0 }
 0x114   : > { %v353_v10 = vadd.f32 %v352_v9, %v276_v8  ;;  %v821_v11 = vpop.f32.mrb[1].mxu0 }
 0x116   : > { %v356_v12 = vmax.f32 %v353_v10, 0.0 }
 0x118   : > { %380 = vrot.lane.b32.xlu1 %v356_v12, %s1017_s15  ;;  %377 = vrot.lane.b32.xlu0 %v356_v12, %s1018_s17 }
 0x119   : > { %823 = vmatpush3.msra.mxu0 %v356_v12 }
 0x11a   : > { %825 = vmatmul.mubr.msk.f32.vlgmr.msra.gmra.mrb[2].mxu0 %vm386_vm5, %v793_v13 }
 0x11c   : > { %612 = vperm.xlu1 %909, %v609_v14  }
 0x18a   : > { %v381_v20 = vpop.permute.xlu1 %380  ;;  %v378_v21 = vpop.permute.xlu0 %377 }
 0x18b   : > { %v379_v22 = vmul.f32 %v791_v18, %v378_v21  ;;  %v382_v24 = vmul.f32 %v792_v19, %v381_v20 }
 0x18d   : > { %828 = vmatpush3.msra.mxu1 %v379_v22 }
 0x18e   : > { %830 = vmatmul.mubr.msk.f32.vlgmr.msra.gmra.mrb[0].mxu1 %vm386_vm5, %v383_v23  ;;  %832 = vmatprep.subr.mxu1 %v1014_v1 }
 0x18f   : > { %833 = vmatpush3.msra.mxu1 %v382_v24  ;;  %834 = vmatprep.mubr.msk.f32.mxu1 %vm1013_vm0, %v1014_v1 }
 0x190   : > { %837 = vmatprep.subr.mxu1 %v1014_v1 }
 0x196   : > { %835 = vmatmul.mubr.msk.f32.vlgmr.msra.gmra.mrb[0].mxu1 %vm386_vm5, %v796_v25 }
 0x197   : > { %838 = vmatpush3.msk.msra.mxu1 %vm282_vm1, %v269_v3  ;;  %839 = vmatprep.mubr.msk.f32.mxu1 %vm1013_vm0, %v1014_v1 }
 0x19b   : > { %v613_v29 = vpop.permute.xlu1 %612 }
 0x19e   : > { %840 = vmatmul.mubr.msk.f32.vlgmr.msra.gmra.mrb[0].mxu1 %vm617_vm8, %v616_v26 }
 0x1ed   : > { %v456_v27 = vpop.f32.mrb[2].mxu0 }
 0x1ee   : > { %v826_v28 = vpop.f32.mrb[3].mxu0  ;;  %v846_v30 = vadd.f32 %v613_v29, %v456_v27 }
 0x271   : > { %v690_v31 = vpop.f32.mrb[0].mxu1 }
 0x272   : > { %v847_v32 = vadd.f32 %v846_v30, %v690_v31  ;;  %v841_v33 = vpop.f32.mrb[1].mxu1 }
 0x274   : > { %v695_v34 = vmax.f32 %v847_v32, 0.0 }
 0x276   : > { %696 = vst [vmem:[%s268_s20] sm:$0xff] %v695_v34 }
 0x277   : > { %953 = shalt.err (!%p950_p3)
}
 0x278   : > { %s954_s7 = scalar_lea.hbm %s1205_s26, 128  ;;  %s958_s16 = scalar_lea.hbm %s1255_s6, 256 }
 0x279   : > { %p955_p5 = scmp.ne.s32.totalorder %s1205_s26, %s954_s7  ;;  %p959_p9 = scmp.lt.u32.totalorder %s1205_s26, %s1255_s6 }
 0x27a   : > { %p960_p0 = scmp.lt.u32.totalorder %s958_s16, %s954_s7  ;;  %p962_p6 = scmp.lt.u32.totalorder %s954_s7, %s1205_s26 }
 0x27b   : > { %p956_p7 = pnand %p955_p5, %p1263_p11 }
 0x27c   : > { %p961_p2 = por %p960_p0, %p959_p9 }
 0x27d   : > { %p957_p8 = pneg %p956_p7 }
 0x27e   : > { %p963_p12 = por %p962_p6, %p961_p2 }
 0x280   : > { %p964_p13 = pnand %p963_p12, %p957_p8 }
 0x282   : > { %967 = shalt.err (!%p964_p13)
}
 0x283   : > { %854 = dma.vmem_to_hbm [thread:$0]  (%p1263_p11), %s1207_s14, 128, %s1205_s26, %s698_s28  }
 0x284 PF: > { %s723_s20 = sand.u32 1, %s994_s21   ;;  %p1264_p4 = scmp.ne.s32.totalorder %s1260_s10, 0 }
 0x285   : > { %p1265_p10 = scmp.ge.s32.totalorder %s1006_s24, 2  ;;  %s724_s15 = scalar_lea.sflag [#allocation4], %s723_s20 }
 0x287   : > { %p861_p1 = pnand %p1265_p10, %p1264_p4 }
 0x289   : > { %989 = dma.done.wait (!%p861_p1), %s724_s15, 128  }
 0x28a   : > { %991 = vsyncadd (!%p861_p1), %s724_s15, 4294967168  ;;  %p19_p3 = scmp.ge.s32.totalorder %s1080_s27, 4   ;;  %s1266_s21 = smov %s998_s22 }
 0x28b   : > { %s1267_s22 = smov %s1002_s23  ;;  %s1268_s23 = smov %s1092_s30 }
 0x28c   : > { %s1269_s24 = smov %s1080_s27  ;;  %21 = sbr.rel (!%p19_p3) target bundleno = 5 (0x5), region = 91 }
 0x293   :  { %729 = vsyncpa [#allocation3], 1 }
 0x294   :  { %731 = vsyncpa [#allocation3 + $0x1], 1 }
 0x295   :  { %732 = vsyncpa [#allocation4], 1 }
 0x296   :  { %734 = vsyncpa [#allocation4 + $0x1], 1 }

</bundles_post_ra>
